<compile_context>
chip_gen: v7x
topology: tpu7x:2x2x1
jax: 0.10.0
libtpu: 0.0.40
codegen_flags: <defaults>
</compile_context>

<pallas_src>
import functools

import jax
import jax.numpy as jnp
from jax import lax
from jax.experimental import pallas as pl
from jax.experimental.pallas import tpu as pltpu


_CHUNK = 8192  # lanes per in-kernel compute chunk (bounds temp VMEM ~2-3 MiB)


def _round_up(n, m):
    return ((n + m - 1) // m) * m


def _mlp_kernel(x_ref, w1_ref, b1_ref, w2_ref, b2_ref, w3_ref, b3_ref, o_ref,
                *, tc, n_chunks):
    """Feature-major MLP: activations are (features, lanes=batch)."""
    w1 = w1_ref[...]   # (10, 5)  f32, VMEM-resident (constant index map)
    b1 = b1_ref[...]   # (10, 1)
    w2 = w2_ref[...]   # (5, 10)
    b2 = b2_ref[...]   # (5, 1)
    w3 = w3_ref[...]   # (1, 5)
    b3 = b3_ref[...]   # (1, 1)

    def process(c):
        # (5, tc) slice of the batch tile; compute in f32 regardless of input dtype.
        x = x_ref[:, pl.ds(c, tc)].astype(jnp.float32)
        h1 = jnp.dot(w1, x, preferred_element_type=jnp.float32) + b1
        h1 = jnp.maximum(h1, 0.0)                                   # (10, tc)
        h2 = jnp.dot(w2, h1, preferred_element_type=jnp.float32) + b2
        h2 = jnp.maximum(h2, 0.0)                                   # (5, tc)
        z = jnp.dot(w3, h2, preferred_element_type=jnp.float32) + b3
        o_ref[:, pl.ds(c, tc)] = jax.nn.sigmoid(z)                  # (1, tc) lane-dense

    if n_chunks == 1:
        process(0)
    else:
        def body(j, carry):
            process(pl.multiple_of(j * tc, tc))
            return carry
        lax.fori_loop(0, n_chunks, body, jnp.int32(0))


def cancer_classifier_forward(x, params, *, tb=None, input_dtype=jnp.bfloat16):
    """Forward pass.

    x: (B, 5) float32 (PyTorch layout).
    params: PyTorch-layout weights: w* are (out, in), b* are (out, 1).
    tb: batch tile (lanes per grid step). None -> auto (~ceil(B/8), capped 128K).
    input_dtype: HBM dtype of the streamed activations (bf16 halves input traffic;
                 all arithmetic stays f32).
    Returns (B, 1) float32 probabilities.
    """
    B = x.shape[0]
    w1, b1 = params["w1"], params["b1"]   # (10, 5), (10, 1)
    w2, b2 = params["w2"], params["b2"]   # (5, 10), (5, 1)
    w3, b3 = params["w3"], params["b3"]   # (1, 5),  (1, 1)

    # --- tile selection (always a multiple of 128 lanes; bounded padding waste) ---
    if tb is None:
        tb = min(128 * 1024, max(128, _round_up(pl.cdiv(B, 8), 128)))
    else:
        tb = max(128, _round_up(int(tb), 128))
    tc = min(tb, _CHUNK)            # in-kernel chunk (multiple of 128)
    tb = _round_up(tb, tc)          # make the chunk loop exact
    bp = _round_up(B, tb)
    n_chunks = tb // tc
    grid = (bp // tb,)

    # --- single fused layout pass: cast + transpose + pad (no zero-buffer init) ---
    x_t = jnp.pad(x.astype(input_dtype).T, ((0, 0), (0, bp - B)))   # (5, bp)

    const = lambda shape: pl.BlockSpec(shape, lambda i: (0, 0))
    itemsize = jnp.dtype(input_dtype).itemsize
    weight_bytes = sum(int(a.size) * 4 for a in (w1, b1, w2, b2, w3, b3))
    cost = pl.CostEstimate(
        flops=210 * bp,                    # 2*(5*10 + 10*5 + 5*1) per element
        transcendentals=bp,                # one sigmoid per element
        bytes_accessed=5 * bp * itemsize + 4 * bp + weight_bytes,
    )

    kernel = functools.partial(_mlp_kernel, tc=tc, n_chunks=n_chunks)

    out = pl.pallas_call(
        kernel,
        out_shape=jax.ShapeDtypeStruct((1, bp), jnp.float32),
        grid=grid,
        in_specs=[
            pl.BlockSpec((5, tb), lambda i: (0, i)),   # batch on the lane axis
            const(w1.shape), const(b1.shape),          # weights/biases VMEM-resident
            const(w2.shape), const(b2.shape),
            const(w3.shape), const(b3.shape),
        ],
        out_specs=pl.BlockSpec((1, tb), lambda i: (0, i)),  # lane-dense output slab
        compiler_params=pltpu.CompilerParams(
            dimension_semantics=("parallel",),      # shard batch tiles across TCs
            vmem_limit_bytes=48 * 1024 * 1024,      # headroom for large tiles; < v7x 64 MiB
        ),
        cost_estimate=cost,
    )(x_t, w1, b1, w2, b2, w3, b3)

    # Back to PyTorch-shaped (B, 1); drop lane padding.
    return out[:, :B].T


def init_params(key):
    """Deterministic init mimicking torch.nn.Linear default U(-1/sqrt(fan_in), +)."""
    def linear(k, fan_in, fan_out):
        kw, kb = jax.random.split(k)
        bound = 1.0 / jnp.sqrt(fan_in)
        w = jax.random.uniform(kw, (fan_out, fan_in), jnp.float32, -bound, bound)
        b = jax.random.uniform(kb, (fan_out, 1), jnp.float32, -bound, bound)
        return w, b

    k1, k2, k3 = jax.random.split(key, 3)
    w1, b1 = linear(k1, 5, 10)
    w2, b2 = linear(k2, 10, 5)
    w3, b3 = linear(k3, 5, 1)
    return {"w1": w1, "b1": b1, "w2": w2, "b2": b2, "w3": w3, "b3": b3}


def _reference(x, p):
    h1 = jnp.maximum(x @ p["w1"].T + p["b1"].T, 0.0)
    h2 = jnp.maximum(h1 @ p["w2"].T + p["b2"].T, 0.0)
    return jax.nn.sigmoid(h2 @ p["w3"].T + p["b3"].T)


if __name__ == "__main__":
    key = jax.random.PRNGKey(0)
    kx, kx2, kx3, kp = jax.random.split(key, 4)
    params = init_params(kp)

    def bf16_input_ref(x, p):
        return _reference(x.astype(jnp.bfloat16).astype(jnp.float32), p)

    # 1) Small batch, auto tile (single padded 128-lane tile, single chunk), bf16 input.
    B = 8
    x = jax.random.normal(kx, (B, 5), dtype=jnp.float32)
    out = jax.block_until_ready(cancer_classifier_forward(x, params))
    assert out.shape == (B, 1)
    assert jnp.allclose(out, bf16_input_ref(x, params), atol=1e-5, rtol=1e-5)
    assert jnp.allclose(out, _reference(x, params), atol=2e-2)   # bf16-input quantization only

    # 2) Multi-tile grid (tb=128 -> grid=3) with remainder padding, bf16 input.
    B2 = 300
    x2 = jax.random.normal(kx2, (B2, 5), dtype=jnp.float32)
    out2 = jax.block_until_ready(cancer_classifier_forward(x2, params, tb=128))
    assert out2.shape == (B2, 1)
    assert jnp.allclose(out2, bf16_input_ref(x2, params), atol=1e-5, rtol=1e-5)

    # 3) Large tile with multi-chunk inner loop (tb=16384 -> tc=8192, 2 chunks), f32 input
    #    path: exact match to the f32 reference.
    B3 = 1024
    x3 = jax.random.normal(kx3, (B3, 5), dtype=jnp.float32)
    out3 = jax.block_until_ready(
        cancer_classifier_forward(x3, params, tb=16384, input_dtype=jnp.float32))
    assert out3.shape == (B3, 1)
    assert jnp.allclose(out3, _reference(x3, params), atol=1e-5, rtol=1e-5)

    print("KERNEL_OK")
</pallas_src>

<mosaic_0001>
module attributes {stable_mosaic.version = 11 : i64} {
  func.func @_mlp_kernel(%arg0: i32, %arg1: memref<5x128xbf16, #tpu.memory_space<vmem>>, %arg2: memref<10x5xf32, #tpu.memory_space<vmem>>, %arg3: memref<10x1xf32, #tpu.memory_space<vmem>>, %arg4: memref<5x10xf32, #tpu.memory_space<vmem>>, %arg5: memref<5x1xf32, #tpu.memory_space<vmem>>, %arg6: memref<1x5xf32, #tpu.memory_space<vmem>>, %arg7: memref<1x1xf32, #tpu.memory_space<vmem>>, %arg8: memref<1x128xf32, #tpu.memory_space<vmem>>) attributes {dimension_semantics = [#tpu.dimension_semantics<parallel>], iteration_bounds = array<i64: 1>, scalar_prefetch = 0 : i64, scratch_operands = 0 : i64, tpu.core_type = #tpu.core_type<tc>, window_params = [{transform_indices = @transform_0, window_bounds = array<i64: 5, 128>}, {pipeline_mode = #tpu.pipeline_mode<synchronous>, transform_indices = @transform_1, window_bounds = array<i64: 10, 5>}, {pipeline_mode = #tpu.pipeline_mode<synchronous>, transform_indices = @transform_2, window_bounds = array<i64: 10, 1>}, {pipeline_mode = #tpu.pipeline_mode<synchronous>, transform_indices = @transform_3, window_bounds = array<i64: 5, 10>}, {pipeline_mode = #tpu.pipeline_mode<synchronous>, transform_indices = @transform_4, window_bounds = array<i64: 5, 1>}, {pipeline_mode = #tpu.pipeline_mode<synchronous>, transform_indices = @transform_5, window_bounds = array<i64: 1, 5>}, {pipeline_mode = #tpu.pipeline_mode<synchronous>, transform_indices = @transform_6, window_bounds = array<i64: 1, 1>}, {transform_indices = @transform_7, window_bounds = array<i64: 1, 128>}]} {
    %c0 = arith.constant 0 : index
    %c0_0 = arith.constant 0 : index
    %0 = vector.load %arg2[%c0, %c0_0] : memref<10x5xf32, #tpu.memory_space<vmem>>, vector<10x5xf32>
    %c0_1 = arith.constant 0 : index
    %c0_2 = arith.constant 0 : index
    %1 = vector.load %arg3[%c0_1, %c0_2] : memref<10x1xf32, #tpu.memory_space<vmem>>, vector<10x1xf32>
    %c0_3 = arith.constant 0 : index
    %c0_4 = arith.constant 0 : index
    %2 = vector.load %arg4[%c0_3, %c0_4] : memref<5x10xf32, #tpu.memory_space<vmem>>, vector<5x10xf32>
    %c0_5 = arith.constant 0 : index
    %c0_6 = arith.constant 0 : index
    %3 = vector.load %arg5[%c0_5, %c0_6] : memref<5x1xf32, #tpu.memory_space<vmem>>, vector<5x1xf32>
    %c0_7 = arith.constant 0 : index
    %c0_8 = arith.constant 0 : index
    %4 = vector.load %arg6[%c0_7, %c0_8] : memref<1x5xf32, #tpu.memory_space<vmem>>, vector<1x5xf32>
    %c0_9 = arith.constant 0 : index
    %c0_10 = arith.constant 0 : index
    %5 = vector.load %arg7[%c0_9, %c0_10] : memref<1x1xf32, #tpu.memory_space<vmem>>, vector<1x1xf32>
    %c0_11 = arith.constant 0 : index
    %c0_12 = arith.constant 0 : index
    %6 = vector.load %arg1[%c0_11, %c0_12] : memref<5x128xbf16, #tpu.memory_space<vmem>>, vector<5x128xbf16>
    %7 = arith.extf %6 : vector<5x128xbf16> to vector<5x128xf32>
    %cst = arith.constant dense<0.000000e+00> : vector<10x128xf32>
    %8 = tpu.matmul %0, %7, %cst {dimension_numbers = #tpu.dot_dimension_numbers<[1], [0], [0], [1], [0, 0, 1, 1], [], []>} : vector<10x5xf32>, vector<5x128xf32>, vector<10x128xf32> -> vector<10x128xf32>
    %9 = vector.broadcast %1 : vector<10x1xf32> to vector<10x128xf32>
    %10 = arith.addf %8, %9 : vector<10x128xf32>
    %cst_13 = arith.constant 0.000000e+00 : f32
    %11 = vector.broadcast %cst_13 : f32 to vector<10x128xf32>
    %12 = arith.maximumf %10, %11 : vector<10x128xf32>
    %cst_14 = arith.constant dense<0.000000e+00> : vector<5x128xf32>
    %13 = tpu.matmul %2, %12, %cst_14 {dimension_numbers = #tpu.dot_dimension_numbers<[1], [0], [0], [1], [0, 0, 1, 1], [], []>} : vector<5x10xf32>, vector<10x128xf32>, vector<5x128xf32> -> vector<5x128xf32>
    %14 = vector.broadcast %3 : vector<5x1xf32> to vector<5x128xf32>
    %15 = arith.addf %13, %14 : vector<5x128xf32>
    %cst_15 = arith.constant 0.000000e+00 : f32
    %16 = vector.broadcast %cst_15 : f32 to vector<5x128xf32>
    %17 = arith.maximumf %15, %16 : vector<5x128xf32>
    %cst_16 = arith.constant dense<0.000000e+00> : vector<1x128xf32>
    %18 = tpu.matmul %4, %17, %cst_16 {dimension_numbers = #tpu.dot_dimension_numbers<[1], [0], [0], [1], [0, 0, 1, 1], [], []>} : vector<1x5xf32>, vector<5x128xf32>, vector<1x128xf32> -> vector<1x128xf32>
    %19 = vector.broadcast %5 : vector<1x1xf32> to vector<1x128xf32>
    %20 = arith.addf %18, %19 : vector<1x128xf32>
    %21 = arith.negf %20 : vector<1x128xf32>
    %22 = math.exp %21 : vector<1x128xf32>
    %cst_17 = arith.constant 1.000000e+00 : f32
    %23 = vector.broadcast %cst_17 : f32 to vector<1x128xf32>
    %24 = arith.addf %23, %22 : vector<1x128xf32>
    %25 = arith.divf %23, %24 : vector<1x128xf32>
    %c0_18 = arith.constant 0 : index
    %c0_19 = arith.constant 0 : index
    %26 = vector.load %arg8[%c0_18, %c0_19] : memref<1x128xf32, #tpu.memory_space<vmem>>, vector<1x128xf32>
    tpu.vector_store %arg8[%c0_18, %c0_19], %25 {strides = array<i32>} : memref<1x128xf32, #tpu.memory_space<vmem>>, vector<1x128xf32>,
    return
  }
  func.func @transform_0(%arg0: i32) -> (i32, i32) {
    %c0_i32 = arith.constant 0 : i32
    %c0_i32_0 = arith.constant 0 : i32
    return %c0_i32, %arg0 : i32, i32
  }
  func.func @transform_1(%arg0: i32) -> (i32, i32) {
    %c0_i32 = arith.constant 0 : i32
    %c0_i32_0 = arith.constant 0 : i32
    %c0_i32_1 = arith.constant 0 : i32
    return %c0_i32, %c0_i32_0 : i32, i32
  }
  func.func @transform_2(%arg0: i32) -> (i32, i32) {
    %c0_i32 = arith.constant 0 : i32
    %c0_i32_0 = arith.constant 0 : i32
    %c0_i32_1 = arith.constant 0 : i32
    return %c0_i32, %c0_i32_0 : i32, i32
  }
  func.func @transform_3(%arg0: i32) -> (i32, i32) {
    %c0_i32 = arith.constant 0 : i32
    %c0_i32_0 = arith.constant 0 : i32
    %c0_i32_1 = arith.constant 0 : i32
    return %c0_i32, %c0_i32_0 : i32, i32
  }
  func.func @transform_4(%arg0: i32) -> (i32, i32) {
    %c0_i32 = arith.constant 0 : i32
    %c0_i32_0 = arith.constant 0 : i32
    %c0_i32_1 = arith.constant 0 : i32
    return %c0_i32, %c0_i32_0 : i32, i32
  }
  func.func @transform_5(%arg0: i32) -> (i32, i32) {
    %c0_i32 = arith.constant 0 : i32
    %c0_i32_0 = arith.constant 0 : i32
    %c0_i32_1 = arith.constant 0 : i32
    return %c0_i32, %c0_i32_0 : i32, i32
  }
  func.func @transform_6(%arg0: i32) -> (i32, i32) {
    %c0_i32 = arith.constant 0 : i32
    %c0_i32_0 = arith.constant 0 : i32
    %c0_i32_1 = arith.constant 0 : i32
    return %c0_i32, %c0_i32_0 : i32, i32
  }
  func.func @transform_7(%arg0: i32) -> (i32, i32) {
    %c0_i32 = arith.constant 0 : i32
    %c0_i32_0 = arith.constant 0 : i32
    return %c0_i32, %arg0 : i32, i32
  }
}

</mosaic_0001>

<bundles_post_ra>
// kernel: tpu_custom_call.1
= control target key start
LH: loop header
LB: loop body
LE: loop exit
PB: predicated region body
PF: predicated region fallthrough
CT: control target
= control target key end

     0   :  { %s491_s0 = inlined_call_operand.vmem [shape: bf16[5,128], index: 0, kind: input, shape index: {}]   ;;  %s492_s1 = inlined_call_operand.vmem [shape: f32[10,5], index: 1, kind: input, shape index: {}]   ;;  %s493_s2 = inlined_call_operand.vmem [shape: f32[10,1], index: 2, kind: input, shape index: {}]   ;;  %s494_s3 = inlined_call_operand.vmem [shape: f32[5,10], index: 3, kind: input, shape index: {}]   ;;  %s495_s4 = inlined_call_operand.vmem [shape: f32[5,1], index: 4, kind: input, shape index: {}]   ;;  %s496_s5 = inlined_call_operand.vmem [shape: f32[1,5], index: 5, kind: input, shape index: {}]   ;;  %s497_s6 = inlined_call_operand.<no memory space> [shape: f32[1,1], index: 6, kind: input, shape index: {}]   ;;  %s498_s7 = inlined_call_operand.hbm [shape: f32[1,128], index: 7, kind: output, shape index: {}]  }
   0x1   :  { %v12_v0 = vstv %s497_s6 }
   0x2   :  { %13 = vst [vmem:[#allocation2] sm:$0x1] %v12_v0 }
   0x3   :  { %v37_v1 = vld [vmem:[%s491_s0] sm:$0x7]  ;;  %vm56_vm0 = vcmask 1044480   ;;  %vm49_vm1 = vcmask 39936   ;;  %v400_v4 = vmov 0  }
   0x4   :  { %v29_v2 = vld [vmem:[%s492_s1] sm:$0xff]  ;;  %v38_v3 = vunpack.c.l.bf16 %v37_v1  ;;  %370 = vset.pattern.permute.xlu0 %v400_v4  ;;  %v30_v6 = vld [vmem:[%s492_s1 + $0x8] sm:$0x3]  ;;  %371 = vset.pattern.permute.xlu1 %v400_v4 }
   0x5   :  { %345 = vmatprep.mubr.msk.f32.mxu0 %vm49_vm1, %v29_v2  ;;  %v31_v5 = vld [vmem:[%s493_s2] sm:$0xff] }
   0x6   :  { %41 = vperm.xlu0 %370, %v31_v5  }
   0x7   :  { %14 = vsyncpa [#allocation4], 0  ;;  %343 = vmatprep.subr.msk.mxu0 %vm56_vm0, %v38_v3  ;;  %v32_v7 = vld [vmem:[%s493_s2 + $0x8] sm:$0x3]  ;;  %v401_v8 = vmov 0.0|0.0   ;;  %vm402_vm2 = vmmov 0   ;;  %v226_v28 = vlaneseq }
   0x8   :  { %344 = vmatpush3.msk.msra.mxu0 %vm56_vm0, %v38_v3  ;;  %360 = vmatprep.subr.bf16.mxu1 %v401_v8  ;;  %v403_v9 = vmov 0.0   ;;  %v34_v10 = vld [vmem:[%s495_s4] sm:$0x1f]  ;;  %vm146_vm3 = vcmask 1041408   ;;  %vm404_vm4 = vmmov 1   ;;  %vm142_vm6 = vcmask 80896  }
   0x9   :  { %346 = vmatmul.mubr.msk.f32.vlgmr.msra.gmra.mrb[0].mxu0 %vm49_vm1, %v30_v6  ;;  %352 = vmatprep.mubr.msk.f32.mxu1 %vm402_vm2, %v403_v9  ;;  %v36_v11 = vld [vmem:[#allocation2] sm:$0x1]  ;;  %vm362_vm5 = vmpackc.low %vm146_vm3, %vm404_vm4  ;;  %v227_v29 = vshrl.u32 %v226_v28, 7 }
   0xa   :  { %46 = vperm.xlu0 %370, %v32_v7   ;;  %355 = vmatprep.subr.mxu0 %v403_v9  ;;  %v33_v21 = vld [vmem:[%s494_s3] sm:$0x1f]  ;;  %s405_s3 = smov [#allocation3]  }
   0xb   :  { %357 = vmatprep.mubr.msk.f32.mxu0 %vm402_vm2, %v403_v9  ;;  %139 = vperm.xlu1 %371, %v34_v10   ;;  %v35_v27 = vld [vmem:[%s496_s5] sm:$0x1]  ;;  %v228_v30 = vsub.s32 0, %v227_v29  ;;  %s319_s14 = sshll.u32 %s405_s3, 4  ;;  %s320_s14 = int_to_ptr.vmem [resolvable:$true] %s319_s14 }
   0xc   :  { %s376_s5 = scalar_lea.vmem %s320_s14, 16  ;;  %s380_s15 = scalar_lea.vmem %s320_s14, 32 }
   0xd   :  { %p377_p0 = scmp.ne.s32.totalorder %s320_s14, %s376_s5  ;;  %p381_p1 = scmp.lt.s32.totalorder %s320_s14, %s320_s14 }
   0xe   :  { %p382_p2 = scmp.lt.s32.totalorder %s380_s15, %s376_s5 }
   0xf   :  { %223 = vperm.xlu1 %371, %v36_v11  }
  0x10   :  { %p383_p3 = por %p382_p2, %p381_p1 }
  0x12   :  { %p384_p4 = pnand %p383_p3, %p377_p0 }
  0x85   :  { %v42_v12 = vpop.permute.xlu0 %41 }
  0x89   :  { %v47_v13 = vpop.permute.xlu0 %46 }
  0x8a   :  { %v140_v22 = vpop.permute.xlu1 %139 }
  0x8e   :  { %v224_v31 = vpop.permute.xlu1 %223 }
  0x8f   :  { %v229_v32 = vrot.slane %v224_v31, %v228_v30 }
  0xdc   :  { %v347_v14 = vpop.f32.mrb[0].mxu0 }
  0xdd   :  { %v132_v15 = vadd.f32 %v347_v14, %v47_v13  ;;  %v126_v16 = vpop.f32.mrb[1].mxu0 }
  0xde   :  { %v127_v17 = vadd.f32 %v126_v16, %v42_v12 }
  0xdf   :  { %v136_v18 = vmax.f32 %v132_v15, 0.0 }
  0xe0   :  { %v135_v19 = vmax.f32 %v127_v17, 0.0 }
  0xe2   :  { %v361_v20 = vpack.c.bf16 %v136_v18, %v135_v19 }
  0xe4   :  { %363 = vmatpush3.bf16.msk.msra.mxu1 %vm362_vm5, %v361_v20 }
  0xe7   :  { %353 = vmatmul.mubr.msk.f32.vlgmr.msra.gmra.mrb[0].mxu1 %vm142_vm6, %v33_v21 }
 0x1ba   :  { %v216_v23 = vpop.f32.mrb[0].mxu1 }
 0x1bb   :  { %v217_v24 = vadd.f32 %v216_v23, %v140_v22  ;;  %v354_v25 = vpop.f32.mrb[1].mxu1 }
 0x1bd   :  { %v220_v26 = vmax.f32 %v217_v24, 0.0 }
 0x1bf   :  { %356 = vmatpush3.msk.msra.mxu0 %vm56_vm0, %v220_v26 }
 0x1c0   :  { %358 = vmatmul.mubr.msk.f32.vlgmr.msra.gmra.mrb[2].mxu0 %vm49_vm1, %v35_v27 }
 0x293   :  { %v302_v33 = vpop.f32.mrb[2].mxu0 }
 0x294   :  { %v303_v34 = vadd.f32 %v302_v33, %v229_v32  ;;  %v359_v35 = vpop.f32.mrb[3].mxu0 }
 0x296   :  { %v334_v36 = vmul.f32 -1.442695, %v303_v34 }
 0x298   :  { %372 = vpow2.f32 %v334_v36 }
 0x2a2   :  { %v373_v37 = vpop.eup %372 }
 0x2a3   :  { %v309_v38 = vadd.f32 1.0, %v373_v37 }
 0x2a5   :  { %374 = vrcp.f32 %v309_v38 }
 0x2af   :  { %v375_v39 = vpop.eup %374 }
 0x2b0   :  { %312 = vst [vmem:[#allocation3] sm:$0x1] %v375_v39 }
 0x2b1   :  { %387 = shalt.err (!%p384_p4)
}
 0x2b2   :  { %s388_s18 = scalar_lea.hbm %s498_s7, 16 }
 0x2b3   :  { %p389_p5 = scmp.ne.s32.totalorder %s498_s7, %s388_s18  ;;  %p392_p6 = scmp.lt.u32.totalorder %s388_s18, %s498_s7 }
 0x2b5   :  { %p394_p7 = pnand %p392_p6, %p389_p5 }
 0x2b7   :  { %397 = shalt.err (!%p394_p7)
}
 0x2b8   :  { %322 = dma.vmem_to_hbm [thread:$0]  %s320_s14, 16, %s498_s7, [#allocation4]  }
 0x2b9   :  { %398 = dma.done.wait [#allocation4], 16  }
 0x2ba   :  { %399 = vsyncadd [#allocation4], 4294967280 }
 0x2bb   :  { %326 = vsyncpa [#allocation4], 1 }

</bundles_post_ra>
